<compile_context>
chip_gen: v7x
topology: tpu7x:2x2x1
jax: 0.10.0
libtpu: 0.0.40
codegen_flags: <defaults>
</compile_context>

<pallas_src>
import jax
import jax.numpy as jnp
from jax import lax
from jax.experimental import pallas as pl
from jax.experimental.pallas import tpu as pltpu

STATE_DIM = 4                    # CartPole-v1 observation dim
ACTION_DIM = 2                   # CartPole-v1 action dim
HIDDEN = 128
IN_PAD = 8                       # xT sublane rows: 4 features, ones row, 3 pad
FUSED_HIDDEN = 2 * HIDDEN        # actor hidden || critic hidden
FUSED_P = FUSED_HIDDEN + 8       # + ones-channel (row 256) + sublane padding
OUT_ROWS = 8                     # output slab rows: [p0, p1, value, 0 x 5]
LANE = 128


def _round_up(n, m):
    return ((n + m - 1) // m) * m


def _actor_critic_kernel(xt_ref, w1t_ref, w2t_ref, out_ref):
    # xt_ref:  [8, TB]    rows 0:4 = features^T, row 4 == 1, rows 5:7 == 0
    # w1t_ref: [264, 8]   fused layer-1 weights, bias in col 4, ones-channel row 256
    # w2t_ref: [8, 264]   fused block-diagonal layer-2 weights, bias in col 256
    # out_ref: [8, TB]    row 0/1 = action probs, row 2 = value, rows 3:7 = 0
    xt = xt_ref[...]

    # Layer 1 (actor || critic), bias baked in: [264, 8] @ [8, TB] -> [264, TB], ReLU.
    # TODO(synk): K=8 underfills the MXU; a 5-term VPU broadcast-FMA variant is a
    # marginal latency win if this dot ever shows up on the critical path.
    h = jnp.maximum(
        jnp.dot(w1t_ref[...], xt, preferred_element_type=jnp.float32), 0.0)

    # Layer 2 heads (+ biases via the ones-channel): [8, 264] @ [264, TB] -> [8, TB].
    z = jnp.dot(w2t_ref[...], h, preferred_element_type=jnp.float32)

    l0 = z[0:1, :]
    l1 = z[1:2, :]
    # Exact 2-way softmax in sigmoid form: no max/sum reductions, sums to 1 exactly,
    # overflow-safe (exp->inf gives p0->0, p1->1).
    p0 = pl.reciprocal(1.0 + jnp.exp(l1 - l0), approx=False)
    p1 = 1.0 - p0

    # Rows >= 2 of z already hold [value, 0, 0, 0, 0, 0]; only rows 0/1 are replaced.
    row = lax.broadcasted_iota(jnp.int32, z.shape, 0)
    out = jnp.where(row == 0, p0, jnp.where(row == 1, p1, z))
    out_ref[...] = out.astype(out_ref.dtype)


def actor_critic_forward(x, packed_params, *, batch_tile=512):
    """x: [B, STATE_DIM] float32; packed_params from pack_params().

    Returns (action_probs [B, ACTION_DIM], state_value [B, 1]).
    """
    w1t, w2t = packed_params
    B = x.shape[0]

    # Lane tile (multiple of 128), clamped so tiny batches use a single grid step.
    tb = _round_up(max(batch_tile, LANE), LANE)
    tb = min(tb, _round_up(max(B, 1), LANE))
    b_pad = _round_up(max(B, 1), tb)

    # Lane-dense transposed input slab: rows 0:4 = x^T, row 4 = 1 (bias channel).
    xt = jnp.zeros((IN_PAD, b_pad), jnp.float32)
    xt = xt.at[:STATE_DIM, :B].set(x.T)
    xt = xt.at[STATE_DIM, :].set(1.0)

    grid = (b_pad // tb,)
    out = pl.pallas_call(
        _actor_critic_kernel,
        out_shape=jax.ShapeDtypeStruct((OUT_ROWS, b_pad), jnp.float32),
        grid_spec=pltpu.PrefetchScalarGridSpec(
            num_scalar_prefetch=0,
            grid=grid,
            in_specs=[
                pl.BlockSpec((IN_PAD, tb), lambda i: (0, i)),        # batch-tiled
                pl.BlockSpec((FUSED_P, IN_PAD), lambda i: (0, 0)),   # resident W1t
                pl.BlockSpec((OUT_ROWS, FUSED_P), lambda i: (0, 0)), # resident W2t
            ],
            out_specs=pl.BlockSpec((OUT_ROWS, tb), lambda i: (0, i)),
        ),
        compiler_params=pltpu.CompilerParams(
            dimension_semantics=("parallel",)),
    )(xt, w1t, w2t)

    probs = out[:ACTION_DIM, :B].T
    value = out[ACTION_DIM:ACTION_DIM + 1, :B].T
    return probs, value


def init_params(key):
    """PyTorch nn.Linear-style init: U(-1/sqrt(fan_in), 1/sqrt(fan_in))."""
    keys = jax.random.split(key, 8)

    def linear(kw, kb, fan_in, fan_out):
        bound = 1.0 / jnp.sqrt(jnp.float32(fan_in))
        w = jax.random.uniform(kw, (fan_in, fan_out), jnp.float32, -bound, bound)
        b = jax.random.uniform(kb, (1, fan_out), jnp.float32, -bound, bound)
        return w, b

    w1a, b1a = linear(keys[0], keys[1], STATE_DIM, HIDDEN)
    w2a, b2a = linear(keys[2], keys[3], HIDDEN, ACTION_DIM)
    w1c, b1c = linear(keys[4], keys[5], STATE_DIM, HIDDEN)
    w2c, b2c = linear(keys[6], keys[7], HIDDEN, 1)
    return (w1a, b1a, w2a, b2a, w1c, b1c, w2c, b2c)


def pack_params(params):
    """Fuse actor/critic weights + biases into the 2 transposed slabs the kernel eats."""
    (w1a, b1a, w2a, b2a, w1c, b1c, w2c, b2c) = params

    # w1t[c, 0:4] = layer-1 weights of fused hidden channel c, col 4 = its bias;
    # row 256 is the "ones" channel (picks xT row 4) that carries layer-2 biases.
    w1t = jnp.zeros((FUSED_P, IN_PAD), jnp.float32)
    w1t = w1t.at[:HIDDEN, :STATE_DIM].set(w1a.T)
    w1t = w1t.at[:HIDDEN, STATE_DIM].set(b1a[0])
    w1t = w1t.at[HIDDEN:FUSED_HIDDEN, :STATE_DIM].set(w1c.T)
    w1t = w1t.at[HIDDEN:FUSED_HIDDEN, STATE_DIM].set(b1c[0])
    w1t = w1t.at[FUSED_HIDDEN, STATE_DIM].set(1.0)

    # w2t rows 0/1 = actor logits (hidden cols 0:128), row 2 = critic value
    # (hidden cols 128:256); column 256 = layer-2 biases (hits the ones-channel).
    w2t = jnp.zeros((OUT_ROWS, FUSED_P), jnp.float32)
    w2t = w2t.at[0:ACTION_DIM, :HIDDEN].set(w2a.T)
    w2t = w2t.at[0:ACTION_DIM, FUSED_HIDDEN].set(b2a[0])
    w2t = w2t.at[ACTION_DIM, HIDDEN:FUSED_HIDDEN].set(w2c[:, 0])
    w2t = w2t.at[ACTION_DIM, FUSED_HIDDEN].set(b2c[0, 0])
    return (w1t, w2t)


def reference_forward(x, params):
    """Pure-JAX reference on the unfused parameters (matches the PyTorch module)."""
    (w1a, b1a, w2a, b2a, w1c, b1c, w2c, b2c) = params
    hp = lax.Precision.HIGHEST
    h_a = jnp.maximum(jnp.dot(x, w1a, precision=hp) + b1a, 0.0)
    probs = jax.nn.softmax(jnp.dot(h_a, w2a, precision=hp) + b2a, axis=-1)
    h_c = jnp.maximum(jnp.dot(x, w1c, precision=hp) + b1c, 0.0)
    value = jnp.dot(h_c, w2c, precision=hp) + b2c
    return probs, value


if __name__ == "__main__":
    key = jax.random.PRNGKey(0)
    k_x, k_p = jax.random.split(key)

    B = 8  # small demo batch; wrapper pads the lane axis up to 128 internally
    x = jax.random.normal(k_x, (B, STATE_DIM), dtype=jnp.float32)
    params = init_params(k_p)
    packed = pack_params(params)

    probs, value = actor_critic_forward(x, packed)
    jax.block_until_ready((probs, value))

    ref_probs, ref_value = reference_forward(x, params)
    assert probs.shape == (B, ACTION_DIM) and value.shape == (B, 1)
    assert jnp.allclose(probs, ref_probs, atol=1e-5, rtol=1e-5)
    assert jnp.allclose(value, ref_value, atol=1e-5, rtol=1e-5)
    assert jnp.allclose(jnp.sum(probs, axis=-1), 1.0, atol=1e-6)

    print("KERNEL_OK")
</pallas_src>

<mosaic_0001>
module attributes {stable_mosaic.version = 11 : i64} {
  func.func @_actor_critic_kernel(%arg0: i32, %arg1: memref<8x128xf32, #tpu.memory_space<vmem>>, %arg2: memref<264x8xf32, #tpu.memory_space<vmem>>, %arg3: memref<8x264xf32, #tpu.memory_space<vmem>>, %arg4: memref<8x128xf32, #tpu.memory_space<vmem>>) attributes {dimension_semantics = [#tpu.dimension_semantics<parallel>], iteration_bounds = array<i64: 1>, scalar_prefetch = 0 : i64, scratch_operands = 0 : i64, tpu.core_type = #tpu.core_type<tc>, window_params = [{transform_indices = @transform_0, window_bounds = array<i64: 8, 128>}, {pipeline_mode = #tpu.pipeline_mode<synchronous>, transform_indices = @transform_1, window_bounds = array<i64: 264, 8>}, {pipeline_mode = #tpu.pipeline_mode<synchronous>, transform_indices = @transform_2, window_bounds = array<i64: 8, 264>}, {transform_indices = @transform_3, window_bounds = array<i64: 8, 128>}]} {
    %c0 = arith.constant 0 : index
    %c0_0 = arith.constant 0 : index
    %0 = vector.load %arg1[%c0, %c0_0] : memref<8x128xf32, #tpu.memory_space<vmem>>, vector<8x128xf32>
    %c0_1 = arith.constant 0 : index
    %c0_2 = arith.constant 0 : index
    %1 = vector.load %arg2[%c0_1, %c0_2] : memref<264x8xf32, #tpu.memory_space<vmem>>, vector<264x8xf32>
    %cst = arith.constant dense<0.000000e+00> : vector<264x128xf32>
    %2 = tpu.matmul %1, %0, %cst {dimension_numbers = #tpu.dot_dimension_numbers<[1], [0], [0], [1], [0, 0, 1, 1], [], []>} : vector<264x8xf32>, vector<8x128xf32>, vector<264x128xf32> -> vector<264x128xf32>
    %cst_3 = arith.constant 0.000000e+00 : f32
    %3 = vector.broadcast %cst_3 : f32 to vector<264x128xf32>
    %4 = arith.maximumf %2, %3 : vector<264x128xf32>
    %c0_4 = arith.constant 0 : index
    %c0_5 = arith.constant 0 : index
    %5 = vector.load %arg3[%c0_4, %c0_5] : memref<8x264xf32, #tpu.memory_space<vmem>>, vector<8x264xf32>
    %cst_6 = arith.constant dense<0.000000e+00> : vector<8x128xf32>
    %6 = tpu.matmul %5, %4, %cst_6 {dimension_numbers = #tpu.dot_dimension_numbers<[1], [0], [0], [1], [0, 0, 1, 1], [], []>} : vector<8x264xf32>, vector<264x128xf32>, vector<8x128xf32> -> vector<8x128xf32>
    %7 = vector.extract_strided_slice %6 {offsets = [0, 0], sizes = [1, 128], strides = [1, 1]} : vector<8x128xf32> to vector<1x128xf32>
    %8 = vector.extract_strided_slice %6 {offsets = [1, 0], sizes = [1, 128], strides = [1, 1]} : vector<8x128xf32> to vector<1x128xf32>
    %9 = arith.subf %8, %7 : vector<1x128xf32>
    %10 = math.exp %9 : vector<1x128xf32>
    %cst_7 = arith.constant 1.000000e+00 : f32
    %11 = vector.broadcast %cst_7 : f32 to vector<1x128xf32>
    %12 = arith.addf %11, %10 : vector<1x128xf32>
    %13 = tpu.reciprocal %12 : vector<1x128xf32> -> vector<1x128xf32>
    %cst_8 = arith.constant 1.000000e+00 : f32
    %14 = vector.broadcast %cst_8 : f32 to vector<1x128xf32>
    %15 = arith.subf %14, %13 : vector<1x128xf32>
    %16 = tpu.iota {dimensions = array<i32: 0>} : vector<8x128xi32>
    %c0_i32 = arith.constant 0 : i32
    %17 = vector.broadcast %c0_i32 : i32 to vector<8x128xi32>
    %18 = arith.cmpi eq, %16, %17 : vector<8x128xi32>
    %c1_i32 = arith.constant 1 : i32
    %19 = vector.broadcast %c1_i32 : i32 to vector<8x128xi32>
    %20 = arith.cmpi eq, %16, %19 : vector<8x128xi32>
    %21 = vector.shape_cast %15 : vector<1x128xf32> to vector<1x128xf32>
    %22 = vector.broadcast %21 : vector<1x128xf32> to vector<8x128xf32>
    %23 = arith.select %20, %22, %6 : vector<8x128xi1>, vector<8x128xf32>
    %24 = vector.shape_cast %13 : vector<1x128xf32> to vector<1x128xf32>
    %25 = vector.broadcast %24 : vector<1x128xf32> to vector<8x128xf32>
    %26 = arith.select %18, %25, %23 : vector<8x128xi1>, vector<8x128xf32>
    %c0_9 = arith.constant 0 : index
    %c0_10 = arith.constant 0 : index
    %27 = vector.load %arg4[%c0_9, %c0_10] : memref<8x128xf32, #tpu.memory_space<vmem>>, vector<8x128xf32>
    tpu.vector_store %arg4[%c0_9, %c0_10], %26 {strides = array<i32>} : memref<8x128xf32, #tpu.memory_space<vmem>>, vector<8x128xf32>,
    return
  }
  func.func @transform_0(%arg0: i32) -> (i32, i32) {
    %c0_i32 = arith.constant 0 : i32
    %c0_i32_0 = arith.constant 0 : i32
    return %c0_i32, %arg0 : i32, i32
  }
  func.func @transform_1(%arg0: i32) -> (i32, i32) {
    %c0_i32 = arith.constant 0 : i32
    %c0_i32_0 = arith.constant 0 : i32
    %c0_i32_1 = arith.constant 0 : i32
    return %c0_i32, %c0_i32_0 : i32, i32
  }
  func.func @transform_2(%arg0: i32) -> (i32, i32) {
    %c0_i32 = arith.constant 0 : i32
    %c0_i32_0 = arith.constant 0 : i32
    %c0_i32_1 = arith.constant 0 : i32
    return %c0_i32, %c0_i32_0 : i32, i32
  }
  func.func @transform_3(%arg0: i32) -> (i32, i32) {
    %c0_i32 = arith.constant 0 : i32
    %c0_i32_0 = arith.constant 0 : i32
    return %c0_i32, %arg0 : i32, i32
  }
}

</mosaic_0001>

<bundles_post_ra>
// kernel: tpu_custom_call.1
= control target key start
LH: loop header
LB: loop body
LE: loop exit
PB: predicated region body
PF: predicated region fallthrough
CT: control target
= control target key end

     0   :  { %vm49_vm0 = vcmask 64512   ;;  %v872_v2 = vmov 0.0   ;;  %vm873_vm1 = vmmov 0   ;;  %s1147_s0 = inlined_call_operand.vmem [shape: f32[8,128], index: 0, kind: input, shape index: {}]   ;;  %s1148_s1 = inlined_call_operand.vmem [shape: f32[264,8], index: 1, kind: input, shape index: {}]   ;;  %s1149_s2 = inlined_call_operand.vmem [shape: f32[8,264], index: 2, kind: input, shape index: {}]   ;;  %s1150_s3 = inlined_call_operand.hbm [shape: f32[8,128], index: 3, kind: output, shape index: {}]  }
   0x1   :  { %v15_v0 = vld [vmem:[%s1147_s0] sm:$0xff]  ;;  %701 = vmatprep.subr.mxu0 %v872_v2  ;;  %703 = vmatprep.mubr.msk.f32.mxu0 %vm873_vm1, %v872_v2  ;;  %v17_v3 = vld [vmem:[%s1148_s1 + $0x8] sm:$0xff]  ;;  %v34_v4 = vld [vmem:[%s1148_s1 + $0x90] sm:$0xff] }
   0x2   :  { %v16_v1 = vld [vmem:[%s1148_s1] sm:$0xff]  ;;  %702 = vmatpush3.msra.mxu0 %v15_v0  ;;  %839 = vmatprep.subr.mxu1 %v872_v2  ;;  %v35_v5 = vld [vmem:[%s1148_s1 + $0x98] sm:$0xff]  ;;  %v18_v6 = vld [vmem:[%s1148_s1 + $0x10] sm:$0xff] }
   0x3   :  { %704 = vmatmul.mubr.msk.f32.vlgmr.msra.gmra.mrb[0].mxu0 %vm49_vm0, %v16_v1  ;;  %840 = vmatpush3.msra.mxu1 %v15_v0  ;;  %v36_v7 = vld [vmem:[%s1148_s1 + $0xa0] sm:$0xff] }
   0x4   :  { %706 = vmatprep.mubr.msk.f32.mxu0 %vm873_vm1, %v872_v2  ;;  %757 = vmatprep.mubr.msk.f32.mxu1 %vm873_vm1, %v872_v2 }
   0x5   :  { %758 = vmatmul.mubr.msk.f32.vlgmr.msra.gmra.mrb[0].mxu1 %vm49_vm0, %v34_v4 }
   0x6   :  { %760 = vmatprep.mubr.msk.f32.mxu1 %vm873_vm1, %v872_v2 }
   0x7   :  { %707 = vmatmul.mubr.msk.f32.gmra.mrb[2].mxu0 %vm49_vm0, %v17_v3 }
   0x8   :  { %709 = vmatprep.mubr.msk.f32.mxu0 %vm873_vm1, %v872_v2 }
   0x9   :  { %761 = vmatmul.mubr.msk.f32.gmra.mrb[2].mxu1 %vm49_vm0, %v35_v5 }
   0xa   :  { %763 = vmatprep.mubr.msk.f32.mxu1 %vm873_vm1, %v872_v2 }
   0xb   :  { %710 = vmatmul.mubr.msk.f32.gmra.mrb[4].mxu0 %vm49_vm0, %v18_v6 }
   0xc   :  { %8 = vsyncpa [#allocation3], 0  ;;  %712 = vmatprep.mubr.msk.f32.mxu0 %vm873_vm1, %v872_v2  ;;  %v19_v8 = vld [vmem:[%s1148_s1 + $0x18] sm:$0xff]  ;;  %v37_v9 = vld [vmem:[%s1148_s1 + $0xa8] sm:$0xff] }
   0xd   :  { %764 = vmatmul.mubr.msk.f32.gmra.mrb[4].mxu1 %vm49_vm0, %v36_v7  ;;  %v20_v10 = vld [vmem:[%s1148_s1 + $0x20] sm:$0xff]  ;;  %v38_v11 = vld [vmem:[%s1148_s1 + $0xb0] sm:$0xff]  ;;  %v21_v12 = vld [vmem:[%s1148_s1 + $0x28] sm:$0xff] }
   0xe   :  { %766 = vmatprep.mubr.msk.f32.mxu1 %vm873_vm1, %v872_v2  ;;  %v39_v13 = vld [vmem:[%s1148_s1 + $0xb8] sm:$0xff]  ;;  %v22_v14 = vld [vmem:[%s1148_s1 + $0x30] sm:$0xff]  ;;  %v40_v15 = vld [vmem:[%s1148_s1 + $0xc0] sm:$0xff] }
   0xf   :  { %713 = vmatmul.mubr.msk.f32.gmra.mrb[6].mxu0 %vm49_vm0, %v19_v8  ;;  %v23_v16 = vld [vmem:[%s1148_s1 + $0x38] sm:$0xff]  ;;  %v41_v17 = vld [vmem:[%s1148_s1 + $0xc8] sm:$0xff]  ;;  %v24_v18 = vld [vmem:[%s1148_s1 + $0x40] sm:$0xff] }
  0x10   :  { %715 = vmatprep.mubr.msk.f32.mxu0 %vm873_vm1, %v872_v2  ;;  %v42_v19 = vld [vmem:[%s1148_s1 + $0xd0] sm:$0xff]  ;;  %v25_v20 = vld [vmem:[%s1148_s1 + $0x48] sm:$0xff]  ;;  %v43_v21 = vld [vmem:[%s1148_s1 + $0xd8] sm:$0xff] }
  0x11   :  { %767 = vmatmul.mubr.msk.f32.gmra.mrb[6].mxu1 %vm49_vm0, %v37_v9  ;;  %v26_v22 = vld [vmem:[%s1148_s1 + $0x50] sm:$0xff]  ;;  %v44_v23 = vld [vmem:[%s1148_s1 + $0xe0] sm:$0xff]  ;;  %v27_v24 = vld [vmem:[%s1148_s1 + $0x58] sm:$0xff] }
  0x12   :  { %769 = vmatprep.mubr.msk.f32.mxu1 %vm873_vm1, %v872_v2  ;;  %v45_v25 = vld [vmem:[%s1148_s1 + $0xe8] sm:$0xff]  ;;  %v28_v26 = vld [vmem:[%s1148_s1 + $0x60] sm:$0xff]  ;;  %v46_v27 = vld [vmem:[%s1148_s1 + $0xf0] sm:$0xff] }
  0x13   :  { %716 = vmatmul.mubr.msk.f32.gmra.mrb[8].mxu0 %vm49_vm0, %v20_v10  ;;  %v29_v28 = vld [vmem:[%s1148_s1 + $0x68] sm:$0xff]  ;;  %v47_v29 = vld [vmem:[%s1148_s1 + $0xf8] sm:$0xff]  ;;  %v30_v30 = vld [vmem:[%s1148_s1 + $0x70] sm:$0xff] }
  0x14   :  { %718 = vmatprep.mubr.msk.f32.mxu0 %vm873_vm1, %v872_v2  ;;  %v48_v31 = vld [vmem:[%s1148_s1 + $0x100] sm:$0xff]  ;;  %v31_v32 = vld [vmem:[%s1148_s1 + $0x78] sm:$0xff]  ;;  %v33_v34 = vld [vmem:[%s1148_s1 + $0x88] sm:$0xff] }
  0x15   :  { %770 = vmatmul.mubr.msk.f32.gmra.mrb[8].mxu1 %vm49_vm0, %v38_v11  ;;  %v32_v33 = vld [vmem:[%s1148_s1 + $0x80] sm:$0xff]  ;;  %v413_v35 = vld [vmem:[%s1149_s2 + $0x8] sm:$0xff] }
  0x16   :  { %772 = vmatprep.mubr.msk.f32.mxu1 %vm873_vm1, %v872_v2 }
  0x17   :  { %719 = vmatmul.mubr.msk.f32.gmra.mrb[10].mxu0 %vm49_vm0, %v21_v12 }
  0x18   :  { %721 = vmatprep.mubr.msk.f32.mxu0 %vm873_vm1, %v872_v2 }
  0x19   :  { %773 = vmatmul.mubr.msk.f32.gmra.mrb[10].mxu1 %vm49_vm0, %v39_v13 }
  0x1a   :  { %775 = vmatprep.mubr.msk.f32.mxu1 %vm873_vm1, %v872_v2 }
  0x1b   :  { %722 = vmatmul.mubr.msk.f32.gmra.mrb[12].mxu0 %vm49_vm0, %v22_v14 }
  0x1c   :  { %724 = vmatprep.mubr.msk.f32.mxu0 %vm873_vm1, %v872_v2 }
  0x1d   :  { %776 = vmatmul.mubr.msk.f32.gmra.mrb[12].mxu1 %vm49_vm0, %v40_v15 }
  0x1e   :  { %778 = vmatprep.mubr.msk.f32.mxu1 %vm873_vm1, %v872_v2 }
  0x1f   :  { %725 = vmatmul.mubr.msk.f32.gmra.mrb[14].mxu0 %vm49_vm0, %v23_v16 }
  0x20   :  { %727 = vmatprep.mubr.msk.f32.mxu0 %vm873_vm1, %v872_v2 }
  0x21   :  { %779 = vmatmul.mubr.msk.f32.gmra.mrb[14].mxu1 %vm49_vm0, %v41_v17 }
  0x22   :  { %781 = vmatprep.mubr.msk.f32.mxu1 %vm873_vm1, %v872_v2 }
  0x23   :  { %728 = vmatmul.mubr.msk.f32.gmra.mrb[16].mxu0 %vm49_vm0, %v24_v18 }
  0x24   :  { %730 = vmatprep.mubr.msk.f32.mxu0 %vm873_vm1, %v872_v2 }
  0x25   :  { %782 = vmatmul.mubr.msk.f32.gmra.mrb[16].mxu1 %vm49_vm0, %v42_v19 }
  0x26   :  { %784 = vmatprep.mubr.msk.f32.mxu1 %vm873_vm1, %v872_v2 }
  0x27   :  { %731 = vmatmul.mubr.msk.f32.gmra.mrb[18].mxu0 %vm49_vm0, %v25_v20 }
  0x28   :  { %733 = vmatprep.mubr.msk.f32.mxu0 %vm873_vm1, %v872_v2 }
  0x29   :  { %785 = vmatmul.mubr.msk.f32.gmra.mrb[18].mxu1 %vm49_vm0, %v43_v21 }
  0x2a   :  { %787 = vmatprep.mubr.msk.f32.mxu1 %vm873_vm1, %v872_v2 }
  0x2b   :  { %734 = vmatmul.mubr.msk.f32.gmra.mrb[20].mxu0 %vm49_vm0, %v26_v22 }
  0x2c   :  { %736 = vmatprep.mubr.msk.f32.mxu0 %vm873_vm1, %v872_v2 }
  0x2d   :  { %788 = vmatmul.mubr.msk.f32.gmra.mrb[20].mxu1 %vm49_vm0, %v44_v23 }
  0x2e   :  { %790 = vmatprep.mubr.msk.f32.mxu1 %vm873_vm1, %v872_v2 }
  0x2f   :  { %737 = vmatmul.mubr.msk.f32.gmra.mrb[22].mxu0 %vm49_vm0, %v27_v24 }
  0x30   :  { %739 = vmatprep.mubr.msk.f32.mxu0 %vm873_vm1, %v872_v2 }
  0x31   :  { %791 = vmatmul.mubr.msk.f32.gmra.mrb[22].mxu1 %vm49_vm0, %v45_v25 }
  0x32   :  { %793 = vmatprep.mubr.msk.f32.mxu1 %vm873_vm1, %v872_v2 }
  0x33   :  { %740 = vmatmul.mubr.msk.f32.gmra.mrb[24].mxu0 %vm49_vm0, %v28_v26 }
  0x34   :  { %742 = vmatprep.mubr.msk.f32.mxu0 %vm873_vm1, %v872_v2 }
  0x35   :  { %794 = vmatmul.mubr.msk.f32.gmra.mrb[24].mxu1 %vm49_vm0, %v46_v27 }
  0x36   :  { %796 = vmatprep.mubr.msk.f32.mxu1 %vm873_vm1, %v872_v2 }
  0x37   :  { %743 = vmatmul.mubr.msk.f32.gmra.mrb[26].mxu0 %vm49_vm0, %v29_v28 }
  0x38   :  { %745 = vmatprep.mubr.msk.f32.mxu0 %vm873_vm1, %v872_v2 }
  0x39   :  { %797 = vmatmul.mubr.msk.f32.gmra.mrb[26].mxu1 %vm49_vm0, %v47_v29 }
  0x3a   :  { %799 = vmatprep.mubr.msk.f32.mxu1 %vm873_vm1, %v872_v2 }
  0x3b   :  { %746 = vmatmul.mubr.msk.f32.gmra.mrb[28].mxu0 %vm49_vm0, %v30_v30 }
  0x3c   :  { %748 = vmatprep.mubr.msk.f32.mxu0 %vm873_vm1, %v872_v2 }
  0x3d   :  { %800 = vmatmul.mubr.msk.f32.gmra.mrb[28].mxu1 %vm49_vm0, %v48_v31 }
  0x3e   :  { %482 = vmatprep.mubr.f32.mxu1 %v413_v35 }
  0x3f   :  { %749 = vmatmul.mubr.msk.f32.gmra.mrb[30].mxu0 %vm49_vm0, %v31_v32 }
  0x40   :  { %751 = vmatprep.mubr.msk.f32.mxu0 %vm873_vm1, %v872_v2 }
  0x43   :  { %752 = vmatmul.mubr.msk.f32.gmra.mrb[32].mxu0 %vm49_vm0, %v32_v33 }
  0x44   :  { %754 = vmatprep.mubr.msk.f32.mxu0 %vm873_vm1, %v872_v2 }
  0x47   :  { %755 = vmatmul.mubr.msk.f32.gmra.mrb[34].mxu0 %vm49_vm0, %v33_v34 }
  0xd6   :  { %v215_v36 = vpop.f32.mrb[0].mxu0 }
  0xd7   :  { %v705_v37 = vpop.f32.mrb[1].mxu0  ;;  %v379_v41 = vmax.f32 %v215_v36, 0.0 }
  0xd8   :  { %v305_v38 = vpop.f32.mrb[0].mxu1 }
  0xd9   :  { %v759_v39 = vpop.f32.mrb[1].mxu1  ;;  %v397_v44 = vmax.f32 %v305_v38, 0.0 }
  0xda   :  { %v220_v40 = vpop.f32.mrb[2].mxu0 }
  0xdb   :  { %v380_v42 = vmax.f32 %v220_v40, 0.0  ;;  %v708_v43 = vpop.f32.mrb[3].mxu0 }
  0xdc   :  { %v310_v45 = vpop.f32.mrb[2].mxu1 }
  0xdd   :  { %v1101_v46 = vpack.c.bf16 %v380_v42, %v379_v41  ;;  %v398_v47 = vmax.f32 %v310_v45, 0.0  ;;  %v762_v48 = vpop.f32.mrb[3].mxu1 }
  0xde   :  { %v225_v49 = vpop.f32.mrb[4].mxu0 }
  0xdf   :  { %v711_v50 = vpop.f32.mrb[5].mxu0  ;;  %v1103_v51 = vpack.c.bf16 %v398_v47, %v397_v44  ;;  %v381_v55 = vmax.f32 %v225_v49, 0.0 }
  0xe0   :  { %v315_v52 = vpop.f32.mrb[4].mxu1 }
  0xe1   :  { %v765_v53 = vpop.f32.mrb[5].mxu1  ;;  %v399_v58 = vmax.f32 %v315_v52, 0.0 }
  0xe2   :  { %v230_v54 = vpop.f32.mrb[6].mxu0 }
  0xe3   :  { %v382_v56 = vmax.f32 %v230_v54, 0.0  ;;  %v714_v57 = vpop.f32.mrb[7].mxu0 }
  0xe4   :  { %v320_v59 = vpop.f32.mrb[6].mxu1 }
  0xe5   :  { %v1105_v60 = vpack.c.bf16 %v382_v56, %v381_v55  ;;  %v400_v61 = vmax.f32 %v320_v59, 0.0  ;;  %v768_v62 = vpop.f32.mrb[7].mxu1 }
  0xe6   :  { %v235_v63 = vpop.f32.mrb[8].mxu0 }
  0xe7   :  { %v717_v0 = vpop.f32.mrb[9].mxu0  ;;  %v1107_v1 = vpack.c.bf16 %v400_v61, %v399_v58  ;;  %v383_v6 = vmax.f32 %v235_v63, 0.0 }
  0xe8   :  { %v325_v3 = vpop.f32.mrb[8].mxu1 }
  0xe9   :  { %v771_v4 = vpop.f32.mrb[9].mxu1  ;;  %v401_v9 = vmax.f32 %v325_v3, 0.0 }
  0xea   :  { %v240_v5 = vpop.f32.mrb[10].mxu0 }
  0xeb   :  { %v384_v7 = vmax.f32 %v240_v5, 0.0  ;;  %v720_v8 = vpop.f32.mrb[11].mxu0 }
  0xec   :  { %v330_v10 = vpop.f32.mrb[10].mxu1 }
  0xed   :  { %v1109_v11 = vpack.c.bf16 %v384_v7, %v383_v6  ;;  %v402_v12 = vmax.f32 %v330_v10, 0.0  ;;  %v774_v13 = vpop.f32.mrb[11].mxu1 }
  0xee   :  { %v245_v14 = vpop.f32.mrb[12].mxu0 }
  0xef   :  { %v723_v15 = vpop.f32.mrb[13].mxu0  ;;  %v1111_v16 = vpack.c.bf16 %v402_v12, %v401_v9  ;;  %v385_v20 = vmax.f32 %v245_v14, 0.0 }
  0xf0   :  { %v335_v17 = vpop.f32.mrb[12].mxu1 }
  0xf1   :  { %v777_v18 = vpop.f32.mrb[13].mxu1  ;;  %v403_v23 = vmax.f32 %v335_v17, 0.0 }
  0xf2   :  { %v250_v19 = vpop.f32.mrb[14].mxu0 }
  0xf3   :  { %v386_v21 = vmax.f32 %v250_v19, 0.0  ;;  %v726_v22 = vpop.f32.mrb[15].mxu0 }
  0xf4   :  { %v340_v24 = vpop.f32.mrb[14].mxu1 }
  0xf5   :  { %v1113_v25 = vpack.c.bf16 %v386_v21, %v385_v20  ;;  %v404_v26 = vmax.f32 %v340_v24, 0.0  ;;  %v780_v27 = vpop.f32.mrb[15].mxu1 }
  0xf6   :  { %v255_v28 = vpop.f32.mrb[16].mxu0 }
  0xf7   :  { %v729_v29 = vpop.f32.mrb[17].mxu0  ;;  %v1115_v30 = vpack.c.bf16 %v404_v26, %v403_v23  ;;  %v387_v34 = vmax.f32 %v255_v28, 0.0 }
  0xf8   :  { %v345_v31 = vpop.f32.mrb[16].mxu1 }
  0xf9   :  { %v783_v32 = vpop.f32.mrb[17].mxu1  ;;  %v405_v37 = vmax.f32 %v345_v31, 0.0 }
  0xfa   :  { %v260_v33 = vpop.f32.mrb[18].mxu0 }
  0xfb   :  { %v388_v35 = vmax.f32 %v260_v33, 0.0  ;;  %v732_v36 = vpop.f32.mrb[19].mxu0 }
  0xfc   :  { %v350_v38 = vpop.f32.mrb[18].mxu1 }
  0xfd   :  { %v825_v39 = vpack.c.bf16 %v388_v35, %v387_v34  ;;  %v406_v40 = vmax.f32 %v350_v38, 0.0  ;;  %v786_v41 = vpop.f32.mrb[19].mxu1 }
  0xfe   :  { %v265_v42 = vpop.f32.mrb[20].mxu0 }
  0xff   :  { %v735_v43 = vpop.f32.mrb[21].mxu0  ;;  %v827_v44 = vpack.c.bf16 %v406_v40, %v405_v37  ;;  %v389_v49 = vmax.f32 %v265_v42, 0.0 }
 0x100   :  { %v355_v45 = vpop.f32.mrb[20].mxu1 }
 0x101   :  { %v789_v47 = vpop.f32.mrb[21].mxu1  ;;  %v407_v53 = vmax.f32 %v355_v45, 0.0 }
 0x102   :  { %v270_v48 = vpop.f32.mrb[22].mxu0 }
 0x103   :  { %v390_v50 = vmax.f32 %v270_v48, 0.0  ;;  %v738_v52 = vpop.f32.mrb[23].mxu0 }
 0x104   :  { %v360_v54 = vpop.f32.mrb[22].mxu1 }
 0x105   :  { %v829_v55 = vpack.c.bf16 %v390_v50, %v389_v49  ;;  %v408_v56 = vmax.f32 %v360_v54, 0.0  ;;  %v792_v57 = vpop.f32.mrb[23].mxu1 }
 0x106   :  { %v275_v58 = vpop.f32.mrb[24].mxu0 }
 0x107   :  { %v741_v59 = vpop.f32.mrb[25].mxu0  ;;  %v831_v61 = vpack.c.bf16 %v408_v56, %v407_v53  ;;  %v391_v3 = vmax.f32 %v275_v58, 0.0 }
 0x108   :  { %v365_v62 = vpop.f32.mrb[24].mxu1 }
 0x109   :  { %v795_v63 = vpop.f32.mrb[25].mxu1  ;;  %v409_v6 = vmax.f32 %v365_v62, 0.0 }
 0x10a   :  { %v280_v0 = vpop.f32.mrb[26].mxu0 }
 0x10b   :  { %v392_v4 = vmax.f32 %v280_v0, 0.0  ;;  %v744_v5 = vpop.f32.mrb[27].mxu0 }
 0x10c   :  { %v370_v7 = vpop.f32.mrb[26].mxu1 }
 0x10d   :  { %v833_v8 = vpack.c.bf16 %v392_v4, %v391_v3  ;;  %v410_v9 = vmax.f32 %v370_v7, 0.0  ;;  %v798_v10 = vpop.f32.mrb[27].mxu1 }
 0x10e   :  { %v285_v12 = vpop.f32.mrb[28].mxu0 }
 0x10f   :  { %v747_v13 = vpop.f32.mrb[29].mxu0  ;;  %v835_v14 = vpack.c.bf16 %v410_v9, %v409_v6  ;;  %v393_v19 = vmax.f32 %v285_v12, 0.0 }
 0x110   :  { %v375_v15 = vpop.f32.mrb[28].mxu1 }
 0x111   :  { %v801_v17 = vpop.f32.mrb[29].mxu1 }
 0x112   :  { %v290_v18 = vpop.f32.mrb[30].mxu0 }
 0x113   :  { %v394_v20 = vmax.f32 %v290_v18, 0.0  ;;  %v750_v21 = vpop.f32.mrb[31].mxu0 }
 0x115   :  { %v837_v22 = vpack.c.bf16 %v394_v20, %v393_v19 }
 0x116   :  { %v295_v23 = vpop.f32.mrb[32].mxu0 }
 0x117   :  { %v753_v24 = vpop.f32.mrb[33].mxu0  ;;  %v395_v27 = vmax.f32 %v295_v23, 0.0 }
 0x11a   :  { %v300_v26 = vpop.f32.mrb[34].mxu0 }
 0x11b   :  { %v396_v28 = vmax.f32 %v300_v26, 0.0  ;;  %v756_v29 = vpop.f32.mrb[35].mxu0 }
 0x11d   :  { %v807_v31 = vpack.c.bf16 %v396_v28, %v395_v27 }
 0x11f   :  { %808 = vmatprep.subr.bf16.mxu1 %v807_v31 }
 0x120   :  { %810 = vmatpush3.bf16.msra.mxu1 %v1101_v46  ;;  %v411_v46 = vmax.f32 %v375_v15, 0.0 }
 0x121   :  { %812 = vmatprep.subr.bf16.mxu1 %v1103_v51  ;;  %v412_v51 = vld [vmem:[%s1149_s2] sm:$0xff] }
 0x124   :  { %814 = vmatpush3.bf16.msra.mxu1 %v1105_v60  ;;  %v414_v60 = vld [vmem:[%s1149_s2 + $0x10] sm:$0xff]  ;;  %s874_s2 = smov [#allocation2]  }
 0x125   :  { %816 = vmatprep.subr.bf16.mxu1 %v1107_v1  ;;  %s588_s28 = sshll.u32 %s874_s2, 4  ;;  %s589_s28 = int_to_ptr.vmem [resolvable:$true] %s588_s28 }
 0x126   :  { %s848_s29 = scalar_lea.vmem %s589_s28, 128  ;;  %p853_p1 = scmp.lt.s32.totalorder %s589_s28, %s589_s28 }
 0x127   :  { %p849_p0 = scmp.ne.s32.totalorder %s589_s28, %s848_s29  ;;  %p854_p2 = scmp.lt.s32.totalorder %s848_s29, %s848_s29 }
 0x128   :  { %818 = vmatpush3.bf16.msra.mxu1 %v1109_v11 }
 0x129   :  { %820 = vmatprep.subr.bf16.mxu1 %v1111_v16  ;;  %p855_p3 = por %p854_p2, %p853_p1 }
 0x12b   :  { %p856_p4 = pnand %p855_p3, %p849_p0 }
 0x12c   :  { %822 = vmatpush3.bf16.msra.mxu1 %v1113_v25 }
 0x12d   :  { %824 = vmatprep.subr.bf16.mxu1 %v1115_v30 }
 0x130   :  { %826 = vmatpush3.bf16.msra.mxu1 %v825_v39 }
 0x131   :  { %828 = vmatprep.subr.bf16.mxu1 %v827_v44 }
 0x134   :  { %830 = vmatpush3.bf16.msra.mxu1 %v829_v55 }
 0x135   :  { %832 = vmatprep.subr.bf16.mxu1 %v831_v61 }
 0x138   :  { %834 = vmatpush3.bf16.msra.mxu1 %v833_v8 }
 0x139   :  { %836 = vmatprep.subr.bf16.mxu1 %v835_v14 }
 0x13c   :  { %838 = vmatpush3.bf16.msra.mxu1 %v837_v22 }
 0x13d   :  { %802 = vmatprep.subr.mxu1 %v872_v2 }
 0x13f   :  { %483 = vmatmul.mubr.f32.vlgmr.msra.gmra.mrb[30].mxu1 %v412_v51 }
 0x140   :  { %803 = vmatpush3.msra.mxu1 %v411_v46  ;;  %804 = vmatprep.mubr.msk.f32.mxu1 %vm873_vm1, %v872_v2  ;;  %v567_v2 = vlaneseq }
 0x142   :  { %v568_v38 = vshrl.u32 %v567_v2, 7 }
 0x143   :  { %805 = vmatmul.mubr.msk.f32.vlgmr.msra.gmra.mrb[32].mxu1 %vm49_vm0, %v414_v60 }
 0x144   :  { %v573_v40 = vsub.s32 1, %v568_v38  ;;  %vm570_vm2 = vcmp.eq.s32.totalorder %v568_v38, 1  ;;  %vm569_vm3 = vcmp.eq.s32.totalorder %v568_v38, 0 }
 0x212   :  { %v696_v1 = vpop.f32.mrb[30].mxu1 }
 0x213   :  { %v697_v11 = vpop.f32.mrb[31].mxu1 }
 0x214   :  { %v698_v16 = vadd.f32 %v697_v11, %v696_v1 }
 0x216   :  { %v554_v25 = vpop.f32.mrb[32].mxu1 }
 0x217   :  { %v555_v30 = vadd.f32 %v698_v16, %v554_v25  ;;  %v806_v32 = vpop.f32.mrb[33].mxu1 }
 0x219   :  { %v559_v33 = vrot.slane %v555_v30, 7 }
 0x21b   :  { %v561_v34 = vsub.f32 %v555_v30, %v559_v33 }
 0x21d   :  { %v562_v35 = vmul.f32 1.442695, %v561_v34 }
 0x21f   :  { %844 = vpow2.f32 %v562_v35 }
 0x229   :  { %v845_v36 = vpop.eup %844 }
 0x22a   :  { %v564_v37 = vadd.f32 1.0, %v845_v36 }
 0x22c   :  { %846 = vrcp.f32 %v564_v37 }
 0x236   :  { %v847_v39 = vpop.eup %846 }
 0x237   :  { %v566_v41 = vsub.f32 1.0, %v847_v39  ;;  %v579_v43 = vrot.slane %v847_v39, %v573_v40 }
 0x239   :  { %v574_v42 = vrot.slane %v566_v41, %v573_v40 }
 0x23b   :  { %v575_v44 = vsel %vm570_vm2, %v574_v42, %v555_v30 }
 0x23c   :  { %v580_v45 = vsel %vm569_vm3, %v579_v43, %v575_v44 }
 0x23d   :  { %581 = vst [vmem:[#allocation2] sm:$0xff] %v580_v45 }
 0x23e   :  { %859 = shalt.err (!%p856_p4)
}
 0x23f   :  { %s860_s5 = scalar_lea.hbm %s1150_s3, 128 }
 0x240   :  { %p861_p5 = scmp.ne.s32.totalorder %s1150_s3, %s860_s5  ;;  %p864_p6 = scmp.lt.u32.totalorder %s860_s5, %s1150_s3 }
 0x242   :  { %p866_p7 = pnand %p864_p6, %p861_p5 }
 0x244   :  { %869 = shalt.err (!%p866_p7)
}
 0x245   :  { %591 = dma.vmem_to_hbm [thread:$0]  %s589_s28, 128, %s1150_s3, [#allocation3]  }
 0x246   :  { %870 = dma.done.wait [#allocation3], 128  }
 0x247   :  { %871 = vsyncadd [#allocation3], 4294967168 }
 0x248   :  { %595 = vsyncpa [#allocation3], 1 }

</bundles_post_ra>
